<compile_context>
chip_gen: v6e
topology: v6e:2x2x1
jax: 0.10.0
libtpu: 0.0.40
codegen_flags: <defaults>
</compile_context>

<pallas_src>
import math
from functools import partial

import jax
import jax.numpy as jnp
from jax.experimental import pallas as pl
from jax.experimental.pallas import tpu as pltpu

EPS = 1e-5        # torch.nn.GroupNorm default eps
_N_TAP3 = 8       # 2x2x2 taps of the second Conv3d (kernel == stride == 2, asserted)
_K1D = 2          # Conv1d kernel size (stride 1, asserted)


def _gelu_new(x):
    # HF ACT2FN["gelu_new"]: 0.5*x*(1+tanh(sqrt(2/pi)*(x+0.044715*x^3)))
    c = math.sqrt(2.0 / math.pi)
    return 0.5 * x * (1.0 + jnp.tanh(c * (x + 0.044715 * x * x * x)))


# ---------------------------------------------------------------------------
# Fused kernel.  Index contracts (set up by prepare_params / the wrapper im2col):
#   t  = kd1*4 + kh1*2 + kw1            tap of the SECOND Conv3d
#   k  = cin*8 + kd0*4 + kh0*2 + kw0    torch flatten of the first Conv3d patch
#   q  = (ho1*Wo + wo1)*Do + do1        second-Conv3d output position (temporal minor)
#   x0  rows = (t, k), cols = q
#   w0bd[c0*8+t, t*K0+k] = w0[c0, k]    (block-diagonal over t)
#   -> y0 rows = (c0, t), cols = q      == layer-0 output, one row group per channel
#   -> layer-1 is ONE matmul with w1.reshape(C1, C0*8) (natural torch order (c0, t))
#   -> fold z[hw*C1 + c1, do1] via 16 sublane concats; conv1d cols ordered (j, hw, c1)
# ---------------------------------------------------------------------------
def _fused_encoder_kernel(x0_ref, w0bd_ref, pgrp_ref, w1_ref, wc_ref, g_ref, b_ref, o_ref):
    # x0_ref : (bpb, 8*K0, P1) bf16      w0bd_ref: (C0*8, 8*K0) bf16
    # pgrp_ref: (C0*8, C0*8) f32 (0/1)   w1_ref : (C1, C0*8) f32
    # wc_ref : (Co, 2*cin1d) f32         g_ref/b_ref: (C0*8, 1) f32
    # o_ref  : (bpb, Co, L_out) f32
    bpb = x0_ref.shape[0]
    P1 = x0_ref.shape[2]
    C1 = w1_ref.shape[0]
    Co, KC = wc_ref.shape
    L_out = o_ref.shape[2]
    T = L_out + _K1D - 1                 # temporal length after the 3D stack (= Do)
    HW = P1 // T                         # Ho*Wo
    cin1d = KC // _K1D                   # conv1d input channels (C1*Ho*Wo)
    assert HW * T == P1 and C1 * HW == cin1d

    w0bd = w0bd_ref[...]
    pgrp = pgrp_ref[...]
    w1 = w1_ref[...]
    wc = wc_ref[...]
    gamma_r = g_ref[...]
    beta_r = b_ref[...]
    inv_n = 1.0 / float(_N_TAP3 * P1)    # GroupNorm group size = 8 rows * P1 lanes

    for b in range(bpb):
        # ---- 3D layer 0: Conv3d(3->C0) as ONE MXU push (block-diag over the 8 taps) ----
        y0 = jnp.dot(w0bd, x0_ref[b], preferred_element_type=jnp.float32)      # (C0*8, P1)

        # ---- GroupNorm(num_groups == num_channels): stats over each 8-row group ----
        mean = jnp.sum(jnp.dot(pgrp, y0, preferred_element_type=jnp.float32),
                       axis=1, keepdims=True) * inv_n                           # (C0*8, 1)
        xc = y0 - mean
        var = jnp.sum(jnp.dot(pgrp, xc * xc, preferred_element_type=jnp.float32),
                      axis=1, keepdims=True) * inv_n                            # biased, as torch
        scale = gamma_r * jax.lax.rsqrt(var + EPS)
        a0 = _gelu_new(xc * scale + beta_r)                                      # (C0*8, P1) f32

        # ---- 3D layer 1: Conv3d(C0->C1) as ONE matmul (natural torch weight flatten) ----
        a1 = _gelu_new(jnp.dot(w1, a0, preferred_element_type=jnp.float32))      # (C1, P1) f32

        # ---- fold (c1, hw, do) -> conv1d channel axis: z[hw*C1 + c1, do] ----
        z = jnp.concatenate([a1[:, hw * T:(hw + 1) * T] for hw in range(HW)], axis=0)  # (cin1d, T)

        # ---- Conv1d (k=2, s=1): both temporal taps in ONE K=2*cin1d matmul + gelu ----
        zcat = jnp.concatenate([z[:, j:j + L_out] for j in range(_K1D)], axis=0)       # (2*cin1d, L_out)
        o_ref[b] = _gelu_new(jnp.dot(wc, zcat, preferred_element_type=jnp.float32))    # (Co, L_out)


# ---------------------------------------------------------------------------
# One-time parameter prep (hoisted out of the jitted forward; review item 1).
# ---------------------------------------------------------------------------
def prepare_params(params):
    w0 = jnp.asarray(params["conv3d_0_w"])    # (C0, Cin, 2, 2, 2)
    w1 = jnp.asarray(params["conv3d_1_w"])    # (C1, C0, 2, 2, 2)
    wc = jnp.asarray(params["conv1d_1_w"])    # (Co, C1*Ho*Wo, 2)
    gamma = jnp.asarray(params["gn0_gamma"])
    beta = jnp.asarray(params["gn0_beta"])

    C0, Cin = w0.shape[0], w0.shape[1]
    C1 = w1.shape[0]
    Co, Ci1d, k1d = wc.shape
    assert w0.shape[2:] == (2, 2, 2), "layer-0 Conv3d must be kernel==stride==2"
    assert w1.shape == (C1, C0, 2, 2, 2), "layer-1 Conv3d must be kernel==stride==2"
    assert k1d == _K1D, "Conv1d kernel must be 2 (stride 1)"
    assert Ci1d % C1 == 0
    HW = Ci1d // C1
    K0 = Cin * 8

    # Block-diagonal layer-0 weight: w0bd[c0*8+t, t*K0+k] = w0flat[c0, k]
    w0flat = w0.reshape(C0, K0).astype(jnp.float32)
    eye_t = jnp.eye(_N_TAP3, dtype=jnp.float32)
    w0bd = jnp.einsum("ck,tu->ctuk", w0flat, eye_t).reshape(C0 * _N_TAP3, _N_TAP3 * K0)
    w0bd = w0bd.astype(jnp.bfloat16)

    # 0/1 same-channel-group selector for the GroupNorm reduce (groups of 8 rows).
    grp = jnp.arange(C0 * _N_TAP3) // _N_TAP3
    pgrp = (grp[:, None] == grp[None, :]).astype(jnp.float32)

    # Layer-1 weight in natural torch flatten (columns = (c0, t)).
    w1nat = w1.reshape(C1, C0 * _N_TAP3).astype(jnp.float32)

    # Conv1d weight, columns reordered to (j, hw, c1) to match the in-kernel fold.
    wcr = (wc.reshape(Co, C1, HW, _K1D).transpose(0, 3, 2, 1)
             .reshape(Co, _K1D * Ci1d).astype(jnp.float32))

    gamma_r = jnp.repeat(gamma.astype(jnp.float32), _N_TAP3).reshape(C0 * _N_TAP3, 1)
    beta_r = jnp.repeat(beta.astype(jnp.float32), _N_TAP3).reshape(C0 * _N_TAP3, 1)

    return {"w0bd": w0bd, "pgrp": pgrp, "w1": w1nat, "wc": wcr,
            "gamma": gamma_r, "beta": beta_r}


def _batch_per_block(batch_size):
    # v5e/v6e have a single TensorCore: fold the whole batch into one grid step.
    # Anything else (v7x, megacore chips): one batch element per "parallel" grid step.
    try:
        kind = jax.devices()[0].device_kind.lower()
    except Exception:
        kind = ""
    single_tc = any(tag in kind for tag in ("v5 lite", "v5e", "v5lite", "v6 lite", "v6e"))
    return batch_size if single_tc else 1


@partial(jax.jit, static_argnames=("bpb",))
def _forward(x, prep, bpb):
    B, Cin, D, H, W = x.shape
    C0n, K0n = prep["w0bd"].shape            # (C0*8, 8*K0)
    K0 = K0n // _N_TAP3
    C1 = prep["w1"].shape[0]
    Co, KC = prep["wc"].shape
    cin1d = KC // _K1D
    assert K0 == Cin * 8, "input channels do not match conv3d_0 weight"
    Do, Ho, Wo = D // 4, H // 4, W // 4
    assert (D, H, W) == (4 * Do, 4 * Ho, 4 * Wo), "spatial dims must be multiples of 4"
    assert cin1d == C1 * Ho * Wo, "conv_dim[0] must equal C1*Ho*Wo after the 3D stack"
    assert Do >= _K1D
    L_out = Do - _K1D + 1
    P1 = Do * Ho * Wo

    # Layer-0 im2col, bf16 BEFORE the strided transpose (review item 2).
    # Rows ordered (t, k), columns q = (ho1*Wo + wo1)*Do + do1  (see kernel contract).
    xb = x.astype(jnp.bfloat16)
    xr = xb.reshape(B, Cin, Do, 2, 2, Ho, 2, 2, Wo, 2, 2)
    xt = xr.transpose(0, 3, 6, 9, 1, 4, 7, 10, 5, 8, 2)
    x0p = xt.reshape(B, _N_TAP3 * K0, P1)
    # TODO(synk): the im2col above is still one XLA transpose before the kernel; fusing it
    # into the kernel from a raw (Cin,D,H,W) VMEM block would remove the extra launch.

    grid = (B // bpb,)
    return pl.pallas_call(
        _fused_encoder_kernel,
        out_shape=jax.ShapeDtypeStruct((B, Co, L_out), jnp.float32),
        grid=grid,
        in_specs=[
            pl.BlockSpec((bpb, _N_TAP3 * K0, P1), lambda g: (g, 0, 0)),
            pl.BlockSpec((C0n, K0n), lambda g: (0, 0)),
            pl.BlockSpec((C0n, C0n), lambda g: (0, 0)),
            pl.BlockSpec((C1, C0n), lambda g: (0, 0)),
            pl.BlockSpec((Co, KC), lambda g: (0, 0)),
            pl.BlockSpec((C0n, 1), lambda g: (0, 0)),
            pl.BlockSpec((C0n, 1), lambda g: (0, 0)),
        ],
        out_specs=pl.BlockSpec((bpb, Co, L_out), lambda g: (g, 0, 0)),
        compiler_params=pltpu.CompilerParams(dimension_semantics=("parallel",)),
    )(x0p, prep["w0bd"], prep["pgrp"], prep["w1"], prep["wc"], prep["gamma"], prep["beta"])


def sign2vec_feature_encoder(x, prep):
    bpb = _batch_per_block(x.shape[0])
    if x.shape[0] % bpb != 0:
        bpb = 1
    return _forward(x, prep, bpb=bpb)


# ---------------------------------------------------------------------------
# Pure-JAX reference (f32, same math as the torch module) for a self-check.
# ---------------------------------------------------------------------------
def _patches_3d_nonoverlap(x, k):
    B, C, D, H, W = x.shape
    kd, kh, kw = k
    Do, Ho, Wo = D // kd, H // kh, W // kw
    x = x.reshape(B, C, Do, kd, Ho, kh, Wo, kw)
    x = x.transpose(0, 2, 4, 6, 1, 3, 5, 7)      # (B, Do, Ho, Wo, C, kd, kh, kw)
    return x.reshape(B, Do * Ho * Wo, C * kd * kh * kw), (Do, Ho, Wo)


def _reference_forward(x, params):
    hi = jax.lax.Precision.HIGHEST
    B = x.shape[0]
    # 3D layer 0: Conv3d + GroupNorm(groups == channels) + gelu_new
    w0 = params["conv3d_0_w"]; C0 = w0.shape[0]
    p, (Do, Ho, Wo) = _patches_3d_nonoverlap(x, (2, 2, 2))
    y = jnp.einsum("bpk,ck->bpc", p, w0.reshape(C0, -1), precision=hi)
    mean = jnp.mean(y, axis=1, keepdims=True)
    var = jnp.mean(jnp.square(y - mean), axis=1, keepdims=True)
    y = (y - mean) * jax.lax.rsqrt(var + EPS)
    y = _gelu_new(y * params["gn0_gamma"] + params["gn0_beta"])
    h = y.reshape(B, Do, Ho, Wo, C0).transpose(0, 4, 1, 2, 3)
    # 3D layer 1: Conv3d + gelu_new
    w1 = params["conv3d_1_w"]; C1 = w1.shape[0]
    p, (Do, Ho, Wo) = _patches_3d_nonoverlap(h, (2, 2, 2))
    y = _gelu_new(jnp.einsum("bpk,ck->bpc", p, w1.reshape(C1, -1), precision=hi))
    h = y.reshape(B, Do, Ho, Wo, C1).transpose(0, 4, 1, 2, 3)
    # torch: transpose(1,2).reshape(B, D', -1).transpose(1,2)
    h = h.transpose(0, 2, 1, 3, 4).reshape(B, Do, -1).transpose(0, 2, 1)   # (B, C1*Ho*Wo, Do)
    # 1D conv (k=2, s=1) + gelu_new
    wc = params["conv1d_1_w"]; Co, Ci, k = wc.shape
    L_out = h.shape[2] - k + 1
    cols = jnp.stack([h[:, :, j:j + L_out] for j in range(k)], axis=-1)    # (B, Ci, L_out, k)
    return _gelu_new(jnp.einsum("bclk,ock->bol", cols, wc, precision=hi))


# ---------------------------------------------------------------------------
if __name__ == "__main__":
    key = jax.random.PRNGKey(0)
    k_x, k_w0, k_w1, k_w1d, k_g, k_b = jax.random.split(key, 6)

    # Input: (B, 3, D, H, W) — 3 input channels (layer_id=0 of the group-norm branch).
    x = jax.random.normal(k_x, (2, 3, 16, 16, 16), dtype=jnp.float32)

    params = {
        "conv3d_0_w": 0.05 * jax.random.normal(k_w0, (4, 3, 2, 2, 2), dtype=jnp.float32),
        "gn0_gamma": 1.0 + 0.01 * jax.random.normal(k_g, (4,), dtype=jnp.float32),
        "gn0_beta": 0.01 * jax.random.normal(k_b, (4,), dtype=jnp.float32),
        "conv3d_1_w": 0.05 * jax.random.normal(k_w1, (8, 4, 2, 2, 2), dtype=jnp.float32),
        # conv_dim[0] = 128 must equal C1 * Ho * Wo = 8*4*4 after the 3D stack.
        "conv1d_1_w": 0.05 * jax.random.normal(k_w1d, (64, 128, 2), dtype=jnp.float32),
    }

    prep = prepare_params(params)   # one-time layout/cast, hoisted out of the forward
    out = jax.block_until_ready(sign2vec_feature_encoder(x, prep))
    assert out.shape == (2, 64, 3), out.shape
    assert out.dtype == jnp.float32

    # Self-check against the f32 pure-JAX reference (layer-0 matmul operands are bf16).
    ref = jax.block_until_ready(_reference_forward(x, params))
    max_err = float(jnp.max(jnp.abs(out - ref)))
    assert max_err < 3e-2, f"max abs err vs reference = {max_err}"

    # TODO(synk): the module's debug print() calls and gradient-checkpointing/training
    # branches are logging/training glue with no kernel equivalent; forward math is covered.
    print("KERNEL_OK")
</pallas_src>

<mosaic_0001>
module attributes {stable_mosaic.version = 11 : i64} {
  func.func @_fused_encoder_kernel(%arg0: i32, %arg1: memref<1x192x64xbf16, #tpu.memory_space<vmem>>, %arg2: memref<32x192xbf16, #tpu.memory_space<vmem>>, %arg3: memref<32x32xf32, #tpu.memory_space<vmem>>, %arg4: memref<8x32xf32, #tpu.memory_space<vmem>>, %arg5: memref<64x256xf32, #tpu.memory_space<vmem>>, %arg6: memref<32x1xf32, #tpu.memory_space<vmem>>, %arg7: memref<32x1xf32, #tpu.memory_space<vmem>>, %arg8: memref<1x64x3xf32, #tpu.memory_space<vmem>>) attributes {dimension_semantics = [#tpu.dimension_semantics<parallel>], iteration_bounds = array<i64: 2>, scalar_prefetch = 0 : i64, scratch_operands = 0 : i64, tpu.core_type = #tpu.core_type<tc>, window_params = [{transform_indices = @transform_0, window_bounds = array<i64: 1, 192, 64>}, {pipeline_mode = #tpu.pipeline_mode<synchronous>, transform_indices = @transform_1, window_bounds = array<i64: 32, 192>}, {pipeline_mode = #tpu.pipeline_mode<synchronous>, transform_indices = @transform_2, window_bounds = array<i64: 32, 32>}, {pipeline_mode = #tpu.pipeline_mode<synchronous>, transform_indices = @transform_3, window_bounds = array<i64: 8, 32>}, {pipeline_mode = #tpu.pipeline_mode<synchronous>, transform_indices = @transform_4, window_bounds = array<i64: 64, 256>}, {pipeline_mode = #tpu.pipeline_mode<synchronous>, transform_indices = @transform_5, window_bounds = array<i64: 32, 1>}, {pipeline_mode = #tpu.pipeline_mode<synchronous>, transform_indices = @transform_6, window_bounds = array<i64: 32, 1>}, {transform_indices = @transform_7, window_bounds = array<i64: 1, 64, 3>}]} {
    %c0 = arith.constant 0 : index
    %c0_0 = arith.constant 0 : index
    %0 = vector.load %arg2[%c0, %c0_0] : memref<32x192xbf16, #tpu.memory_space<vmem>>, vector<32x192xbf16>
    %c0_1 = arith.constant 0 : index
    %c0_2 = arith.constant 0 : index
    %1 = vector.load %arg3[%c0_1, %c0_2] : memref<32x32xf32, #tpu.memory_space<vmem>>, vector<32x32xf32>
    %c0_3 = arith.constant 0 : index
    %c0_4 = arith.constant 0 : index
    %2 = vector.load %arg4[%c0_3, %c0_4] : memref<8x32xf32, #tpu.memory_space<vmem>>, vector<8x32xf32>
    %c0_5 = arith.constant 0 : index
    %c0_6 = arith.constant 0 : index
    %3 = vector.load %arg5[%c0_5, %c0_6] : memref<64x256xf32, #tpu.memory_space<vmem>>, vector<64x256xf32>
    %c0_7 = arith.constant 0 : index
    %c0_8 = arith.constant 0 : index
    %4 = vector.load %arg6[%c0_7, %c0_8] : memref<32x1xf32, #tpu.memory_space<vmem>>, vector<32x1xf32>
    %c0_9 = arith.constant 0 : index
    %c0_10 = arith.constant 0 : index
    %5 = vector.load %arg7[%c0_9, %c0_10] : memref<32x1xf32, #tpu.memory_space<vmem>>, vector<32x1xf32>
    %c0_11 = arith.constant 0 : index
    %c0_12 = arith.constant 0 : index
    %c0_13 = arith.constant 0 : index
    %6 = vector.load %arg1[%c0_11, %c0_12, %c0_13] : memref<1x192x64xbf16, #tpu.memory_space<vmem>>, vector<1x192x64xbf16>
    %7 = vector.shape_cast %6 : vector<1x192x64xbf16> to vector<192x64xbf16>
    %cst = arith.constant dense<0.000000e+00> : vector<32x64xf32>
    %8 = tpu.matmul %0, %7, %cst {dimension_numbers = #tpu.dot_dimension_numbers<[1], [0], [0], [1], [0, 0, 1, 1], [], []>} : vector<32x192xbf16>, vector<192x64xbf16>, vector<32x64xf32> -> vector<32x64xf32>
    %cst_14 = arith.constant dense<0.000000e+00> : vector<32x64xf32>
    %9 = tpu.matmul %1, %8, %cst_14 {dimension_numbers = #tpu.dot_dimension_numbers<[1], [0], [0], [1], [0, 0, 1, 1], [], []>} : vector<32x32xf32>, vector<32x64xf32>, vector<32x64xf32> -> vector<32x64xf32>
    %cst_15 = arith.constant dense<0.000000e+00> : vector<32xf32>
    %10 = vector.multi_reduction <add>, %9, %cst_15 [1] : vector<32x64xf32> to vector<32xf32>
    %11 = vector.shape_cast %10 : vector<32xf32> to vector<32x1xf32>
    %cst_16 = arith.constant 0.001953125 : f32
    %12 = vector.broadcast %cst_16 : f32 to vector<32x1xf32>
    %13 = arith.mulf %11, %12 : vector<32x1xf32>
    %14 = vector.broadcast %13 : vector<32x1xf32> to vector<32x64xf32>
    %15 = arith.subf %8, %14 : vector<32x64xf32>
    %16 = arith.mulf %15, %15 : vector<32x64xf32>
    %cst_17 = arith.constant dense<0.000000e+00> : vector<32x64xf32>
    %17 = tpu.matmul %1, %16, %cst_17 {dimension_numbers = #tpu.dot_dimension_numbers<[1], [0], [0], [1], [0, 0, 1, 1], [], []>} : vector<32x32xf32>, vector<32x64xf32>, vector<32x64xf32> -> vector<32x64xf32>
    %cst_18 = arith.constant dense<0.000000e+00> : vector<32xf32>
    %18 = vector.multi_reduction <add>, %17, %cst_18 [1] : vector<32x64xf32> to vector<32xf32>
    %19 = vector.shape_cast %18 : vector<32xf32> to vector<32x1xf32>
    %cst_19 = arith.constant 0.001953125 : f32
    %20 = vector.broadcast %cst_19 : f32 to vector<32x1xf32>
    %21 = arith.mulf %19, %20 : vector<32x1xf32>
    %cst_20 = arith.constant 9.99999974E-6 : f32
    %22 = vector.broadcast %cst_20 : f32 to vector<32x1xf32>
    %23 = arith.addf %21, %22 : vector<32x1xf32>
    %24 = math.rsqrt %23 : vector<32x1xf32>
    %25 = arith.mulf %4, %24 : vector<32x1xf32>
    %26 = vector.broadcast %25 : vector<32x1xf32> to vector<32x64xf32>
    %27 = arith.mulf %15, %26 : vector<32x64xf32>
    %28 = vector.broadcast %5 : vector<32x1xf32> to vector<32x64xf32>
    %29 = arith.addf %27, %28 : vector<32x64xf32>
    %cst_21 = arith.constant 5.000000e-01 : f32
    %30 = vector.broadcast %cst_21 : f32 to vector<32x64xf32>
    %31 = arith.mulf %30, %29 : vector<32x64xf32>
    %cst_22 = arith.constant 4.471500e-02 : f32
    %32 = vector.broadcast %cst_22 : f32 to vector<32x64xf32>
    %33 = arith.mulf %32, %29 : vector<32x64xf32>
    %34 = arith.mulf %33, %29 : vector<32x64xf32>
    %35 = arith.mulf %34, %29 : vector<32x64xf32>
    %36 = arith.addf %29, %35 : vector<32x64xf32>
    %cst_23 = arith.constant 0.797884583 : f32
    %37 = vector.broadcast %cst_23 : f32 to vector<32x64xf32>
    %38 = arith.mulf %37, %36 : vector<32x64xf32>
    %39 = math.tanh %38 : vector<32x64xf32>
    %cst_24 = arith.constant 1.000000e+00 : f32
    %40 = vector.broadcast %cst_24 : f32 to vector<32x64xf32>
    %41 = arith.addf %40, %39 : vector<32x64xf32>
    %42 = arith.mulf %31, %41 : vector<32x64xf32>
    %cst_25 = arith.constant dense<0.000000e+00> : vector<8x64xf32>
    %43 = tpu.matmul %2, %42, %cst_25 {dimension_numbers = #tpu.dot_dimension_numbers<[1], [0], [0], [1], [0, 0, 1, 1], [], []>} : vector<8x32xf32>, vector<32x64xf32>, vector<8x64xf32> -> vector<8x64xf32>
    %cst_26 = arith.constant 5.000000e-01 : f32
    %44 = vector.broadcast %cst_26 : f32 to vector<8x64xf32>
    %45 = arith.mulf %44, %43 : vector<8x64xf32>
    %cst_27 = arith.constant 4.471500e-02 : f32
    %46 = vector.broadcast %cst_27 : f32 to vector<8x64xf32>
    %47 = arith.mulf %46, %43 : vector<8x64xf32>
    %48 = arith.mulf %47, %43 : vector<8x64xf32>
    %49 = arith.mulf %48, %43 : vector<8x64xf32>
    %50 = arith.addf %43, %49 : vector<8x64xf32>
    %cst_28 = arith.constant 0.797884583 : f32
    %51 = vector.broadcast %cst_28 : f32 to vector<8x64xf32>
    %52 = arith.mulf %51, %50 : vector<8x64xf32>
    %53 = math.tanh %52 : vector<8x64xf32>
    %cst_29 = arith.constant 1.000000e+00 : f32
    %54 = vector.broadcast %cst_29 : f32 to vector<8x64xf32>
    %55 = arith.addf %54, %53 : vector<8x64xf32>
    %56 = arith.mulf %45, %55 : vector<8x64xf32>
    %57 = vector.extract_strided_slice %56 {offsets = [0, 0], sizes = [8, 4], strides = [1, 1]} : vector<8x64xf32> to vector<8x4xf32>
    %58 = vector.extract_strided_slice %56 {offsets = [0, 4], sizes = [8, 4], strides = [1, 1]} : vector<8x64xf32> to vector<8x4xf32>
    %59 = vector.extract_strided_slice %56 {offsets = [0, 8], sizes = [8, 4], strides = [1, 1]} : vector<8x64xf32> to vector<8x4xf32>
    %60 = vector.extract_strided_slice %56 {offsets = [0, 12], sizes = [8, 4], strides = [1, 1]} : vector<8x64xf32> to vector<8x4xf32>
    %61 = vector.extract_strided_slice %56 {offsets = [0, 16], sizes = [8, 4], strides = [1, 1]} : vector<8x64xf32> to vector<8x4xf32>
    %62 = vector.extract_strided_slice %56 {offsets = [0, 20], sizes = [8, 4], strides = [1, 1]} : vector<8x64xf32> to vector<8x4xf32>
    %63 = vector.extract_strided_slice %56 {offsets = [0, 24], sizes = [8, 4], strides = [1, 1]} : vector<8x64xf32> to vector<8x4xf32>
    %64 = vector.extract_strided_slice %56 {offsets = [0, 28], sizes = [8, 4], strides = [1, 1]} : vector<8x64xf32> to vector<8x4xf32>
    %65 = vector.extract_strided_slice %56 {offsets = [0, 32], sizes = [8, 4], strides = [1, 1]} : vector<8x64xf32> to vector<8x4xf32>
    %66 = vector.extract_strided_slice %56 {offsets = [0, 36], sizes = [8, 4], strides = [1, 1]} : vector<8x64xf32> to vector<8x4xf32>
    %67 = vector.extract_strided_slice %56 {offsets = [0, 40], sizes = [8, 4], strides = [1, 1]} : vector<8x64xf32> to vector<8x4xf32>
    %68 = vector.extract_strided_slice %56 {offsets = [0, 44], sizes = [8, 4], strides = [1, 1]} : vector<8x64xf32> to vector<8x4xf32>
    %69 = vector.extract_strided_slice %56 {offsets = [0, 48], sizes = [8, 4], strides = [1, 1]} : vector<8x64xf32> to vector<8x4xf32>
    %70 = vector.extract_strided_slice %56 {offsets = [0, 52], sizes = [8, 4], strides = [1, 1]} : vector<8x64xf32> to vector<8x4xf32>
    %71 = vector.extract_strided_slice %56 {offsets = [0, 56], sizes = [8, 4], strides = [1, 1]} : vector<8x64xf32> to vector<8x4xf32>
    %72 = vector.extract_strided_slice %56 {offsets = [0, 60], sizes = [8, 4], strides = [1, 1]} : vector<8x64xf32> to vector<8x4xf32>
    %73 = tpu.concatenate %57, %58, %59, %60, %61, %62, %63, %64, %65, %66, %67, %68, %69, %70, %71, %72 in 0 : vector<8x4xf32>, vector<8x4xf32>, vector<8x4xf32>, vector<8x4xf32>, vector<8x4xf32>, vector<8x4xf32>, vector<8x4xf32>, vector<8x4xf32>, vector<8x4xf32>, vector<8x4xf32>, vector<8x4xf32>, vector<8x4xf32>, vector<8x4xf32>, vector<8x4xf32>, vector<8x4xf32>, vector<8x4xf32> -> vector<128x4xf32>
    %74 = vector.extract_strided_slice %73 {offsets = [0, 0], sizes = [128, 3], strides = [1, 1]} : vector<128x4xf32> to vector<128x3xf32>
    %75 = vector.extract_strided_slice %73 {offsets = [0, 1], sizes = [128, 3], strides = [1, 1]} : vector<128x4xf32> to vector<128x3xf32>
    %76 = tpu.concatenate %74, %75 in 0 : vector<128x3xf32>, vector<128x3xf32> -> vector<256x3xf32>
    %cst_30 = arith.constant dense<0.000000e+00> : vector<64x3xf32>
    %77 = tpu.matmul %3, %76, %cst_30 {dimension_numbers = #tpu.dot_dimension_numbers<[1], [0], [0], [1], [0, 0, 1, 1], [], []>} : vector<64x256xf32>, vector<256x3xf32>, vector<64x3xf32> -> vector<64x3xf32>
    %cst_31 = arith.constant 5.000000e-01 : f32
    %78 = vector.broadcast %cst_31 : f32 to vector<64x3xf32>
    %79 = arith.mulf %78, %77 : vector<64x3xf32>
    %cst_32 = arith.constant 4.471500e-02 : f32
    %80 = vector.broadcast %cst_32 : f32 to vector<64x3xf32>
    %81 = arith.mulf %80, %77 : vector<64x3xf32>
    %82 = arith.mulf %81, %77 : vector<64x3xf32>
    %83 = arith.mulf %82, %77 : vector<64x3xf32>
    %84 = arith.addf %77, %83 : vector<64x3xf32>
    %cst_33 = arith.constant 0.797884583 : f32
    %85 = vector.broadcast %cst_33 : f32 to vector<64x3xf32>
    %86 = arith.mulf %85, %84 : vector<64x3xf32>
    %87 = math.tanh %86 : vector<64x3xf32>
    %cst_34 = arith.constant 1.000000e+00 : f32
    %88 = vector.broadcast %cst_34 : f32 to vector<64x3xf32>
    %89 = arith.addf %88, %87 : vector<64x3xf32>
    %90 = arith.mulf %79, %89 : vector<64x3xf32>
    %c0_35 = arith.constant 0 : index
    %c0_36 = arith.constant 0 : index
    %c0_37 = arith.constant 0 : index
    %91 = vector.load %arg8[%c0_35, %c0_36, %c0_37] : memref<1x64x3xf32, #tpu.memory_space<vmem>>, vector<1x64x3xf32>
    %92 = vector.shape_cast %91 : vector<1x64x3xf32> to vector<64x3xf32>
    %93 = vector.shape_cast %90 : vector<64x3xf32> to vector<1x64x3xf32>
    tpu.vector_store %arg8[%c0_35, %c0_36, %c0_37], %93 {strides = array<i32>} : memref<1x64x3xf32, #tpu.memory_space<vmem>>, vector<1x64x3xf32>,
    return
  }
  func.func @transform_0(%arg0: i32) -> (i32, i32, i32) {
    %c0_i32 = arith.constant 0 : i32
    %c0_i32_0 = arith.constant 0 : i32
    %c0_i32_1 = arith.constant 0 : i32
    return %arg0, %c0_i32, %c0_i32_0 : i32, i32, i32
  }
  func.func @transform_1(%arg0: i32) -> (i32, i32) {
    %c0_i32 = arith.constant 0 : i32
    %c0_i32_0 = arith.constant 0 : i32
    %c0_i32_1 = arith.constant 0 : i32
    return %c0_i32, %c0_i32_0 : i32, i32
  }
  func.func @transform_2(%arg0: i32) -> (i32, i32) {
    %c0_i32 = arith.constant 0 : i32
    %c0_i32_0 = arith.constant 0 : i32
    %c0_i32_1 = arith.constant 0 : i32
    return %c0_i32, %c0_i32_0 : i32, i32
  }
  func.func @transform_3(%arg0: i32) -> (i32, i32) {
    %c0_i32 = arith.constant 0 : i32
    %c0_i32_0 = arith.constant 0 : i32
    %c0_i32_1 = arith.constant 0 : i32
    return %c0_i32, %c0_i32_0 : i32, i32
  }
  func.func @transform_4(%arg0: i32) -> (i32, i32) {
    %c0_i32 = arith.constant 0 : i32
    %c0_i32_0 = arith.constant 0 : i32
    %c0_i32_1 = arith.constant 0 : i32
    return %c0_i32, %c0_i32_0 : i32, i32
  }
  func.func @transform_5(%arg0: i32) -> (i32, i32) {
    %c0_i32 = arith.constant 0 : i32
    %c0_i32_0 = arith.constant 0 : i32
    %c0_i32_1 = arith.constant 0 : i32
    return %c0_i32, %c0_i32_0 : i32, i32
  }
  func.func @transform_6(%arg0: i32) -> (i32, i32) {
    %c0_i32 = arith.constant 0 : i32
    %c0_i32_0 = arith.constant 0 : i32
    %c0_i32_1 = arith.constant 0 : i32
    return %c0_i32, %c0_i32_0 : i32, i32
  }
  func.func @transform_7(%arg0: i32) -> (i32, i32, i32) {
    %c0_i32 = arith.constant 0 : i32
    %c0_i32_0 = arith.constant 0 : i32
    %c0_i32_1 = arith.constant 0 : i32
    return %arg0, %c0_i32, %c0_i32_0 : i32, i32, i32
  }
}

</mosaic_0001>

<bundles_post_ra>
// kernel: _forward.1
= control target key start
LH: loop header
LB: loop body
LE: loop exit
PB: predicated region body
PF: predicated region fallthrough
CT: control target
= control target key end

     0   :  { %s1522_s24 = smov 0   ;;  %s1774_s0 = inlined_call_operand.vmem [shape: bf16[2,192,64], index: 0, kind: input, shape index: {}]   ;;  %s1775_s1 = inlined_call_operand.vmem [shape: bf16[32,192], index: 1, kind: input, shape index: {}]   ;;  %s1776_s2 = inlined_call_operand.vmem [shape: f32[32,32], index: 2, kind: input, shape index: {}]   ;;  %s1777_s3 = inlined_call_operand.vmem [shape: f32[8,32], index: 3, kind: input, shape index: {}]   ;;  %s1778_s4 = inlined_call_operand.vmem [shape: f32[64,256], index: 4, kind: input, shape index: {}]   ;;  %s1779_s5 = inlined_call_operand.vmem [shape: f32[32,1], index: 5, kind: input, shape index: {}]   ;;  %s1780_s6 = inlined_call_operand.vmem [shape: f32[32,1], index: 6, kind: input, shape index: {}]   ;;  %s1781_s7 = inlined_call_operand.vmem [shape: f32[2,64,3], index: 7, kind: output, shape index: {}]  }
   0x1 LB: > { %s1219_s25 = sadd.s32 4294967295, %s1461_s24   ;;  %p1223_p0 = scmp.ge.s32.totalorder %s1461_s24, 1  ;;  %s1461_s24 = sphi %s1522_s24, %s17_s24  }
   0x2   : > { %p237_p1 = scmp.lt.s32.totalorder %s1461_s24, 3 }
   0x4   : > { %p238_p2 = pnand %p1223_p0, %p237_p1 }
   0x5   : > { %p269_p3 = scmp.lt.s32.totalorder (!%p238_p2), %s1219_s25, 1  ;;  %s1466_s20 = smov (!%p238_p2), 72  }
   0x6   : > { %241 = sbr.rel (%p238_p2) target bundleno = 1900 (0x76c), region = 48  ;;  %s1467_s21 = smov (!%p238_p2), 68  }
   0x7   : > { %s1468_s22 = smov (!%p238_p2), 80   ;;  %s1469_s23 = smov (!%p238_p2), 76  }
   0x8   : > { %s1470_s26 = smov (!%p238_p2), 88   ;;  %s1471_s27 = smov (!%p238_p2), 84  }
   0x9   : > { %s1473_s29 = smov (!%p238_p2), 92   ;;  %s1474_s30 = smov (!%p238_p2), 104  }
   0xa   : > { %s1476_s9 = smov (!%p238_p2), 112   ;;  %s1477_s10 = smov (!%p238_p2), 108  }
   0xb   : > { %v1463_v0 = vmov 0   ;;  %v1417_v1 = vld [vmem:[%s1775_s1 + $0x4] ss:$8 sps:$4 sm:$0xff]   ;;  %vm427_vm0 = vcmask 523264   ;;  %s1783_s25 = smov (!%p269_p3, %s1219_s25), 1  ;;  %vm483_vm1 = vcmask 261120  }
   0xc   : > { %434 = vmatprep.subr.bf16.mxu0 %v1463_v0  ;;  %1402 = vset.pattern.permute.xlu1 %v1463_v0  ;;  %s1373_s28 = smul.u32 96, %s1783_s25  ;;  %v1415_v14 = vld [vmem:[%s1775_s1] ss:$8 sps:$4 sm:$0xff]   ;;  %v1418_v15 = vld [vmem:[%s1775_s1 + $0x14] ss:$8 sps:$4 sm:$0xff]   ;;  %vm1465_vm2 = vmmov 0  }
   0xd   : > { %1401 = vset.pattern.permute.xlu0 %v1463_v0  ;;  %1243 = vmatprep.mubr.msk.bf16.mxu0 %vm427_vm0, %v1417_v1  ;;  %v1420_v16 = vld [vmem:[%s1775_s1 + $0x10] ss:$8 sps:$4 sm:$0xff]   ;;  %v284_v17 = vld [vmem:[%s1776_s2] sm:$0xff]  ;;  %v285_v26 = vld [vmem:[%s1776_s2 + $0x8] sm:$0xff]  ;;  %s1478_s11 = smov 120   ;;  %s1479_s12 = smov 116  }
   0xe   : > { %s1540_s8 = scalar_lea.vmem %s1774_s0, %s1373_s28  ;;  %1356 = vmatprep.mubr.msk.f32.mxu1 %vm483_vm1, %v284_v17  ;;  %v286_v27 = vld [vmem:[%s1776_s2 + $0x10] sm:$0xff]  ;;  %v287_v28 = vld [vmem:[%s1776_s2 + $0x18] sm:$0xff]  ;;  %s1472_s28 = smov 96   ;;  %vm1155_vm3 = vcmask 23552  }
   0xf   : > { %v1403_v2 = vld [vmem:[%s1540_s8 + $0x38] sm:$0xff]   ;;  %v1404_v3 = vld [vmem:[%s1540_s8 + $0x30] sm:$0xff]   ;;  %v1405_v4 = vld [vmem:[%s1540_s8 + $0x28] sm:$0xff]   ;;  %s1480_s13 = smov 124   ;;  %s1481_s14 = smov 127  }
  0x10   : > { %435 = vmatpush1.bf16.msra.mxu0 %v1403_v2  ;;  %v1406_v5 = vld [vmem:[%s1540_s8 + $0x20] sm:$0xff]   ;;  %v1407_v6 = vld [vmem:[%s1540_s8 + $0x18] sm:$0xff]   ;;  %v1408_v7 = vld [vmem:[%s1540_s8 + $0x10] sm:$0xff]  }
  0x11   : > { %436 = vmatprep.subr.bf16.mxu0 %v1463_v0  ;;  %v1409_v8 = vld [vmem:[%s1540_s8 + $0x8] sm:$0xff]   ;;  %v1410_v9 = vld [vmem:[%s1540_s8] sm:$0xff]   ;;  %v1411_v10 = vld [vmem:[%s1540_s8 + $0x58] sm:$0xff]  }
  0x12   : > { %v1412_v11 = vld [vmem:[%s1540_s8 + $0x50] sm:$0xff]   ;;  %v1413_v12 = vld [vmem:[%s1540_s8 + $0x48] sm:$0xff]   ;;  %v1414_v13 = vld [vmem:[%s1540_s8 + $0x40] sm:$0xff]   ;;  %s1475_s8 = smov 100  }
  0x13   : > { %v312_v61 = vld [vmem:[%s1780_s6 + $0x18] sm:$0xff] }
  0x14   : > { %437 = vmatpush1.bf16.msra.mxu0 %v1404_v3 }
  0x15   : > { %438 = vmatprep.subr.bf16.mxu0 %v1463_v0 }
  0x18   : > { %439 = vmatpush1.bf16.msra.mxu0 %v1405_v4 }
  0x19   : > { %440 = vmatprep.subr.bf16.mxu0 %v1463_v0 }
  0x1c   : > { %441 = vmatpush1.bf16.msra.mxu0 %v1406_v5 }
  0x1d   : > { %442 = vmatprep.subr.bf16.mxu0 %v1463_v0 }
  0x20   : > { %443 = vmatpush1.bf16.msra.mxu0 %v1407_v6 }
  0x21   : > { %444 = vmatprep.subr.bf16.mxu0 %v1463_v0 }
  0x24   : > { %445 = vmatpush1.bf16.msra.mxu0 %v1408_v7 }
  0x25   : > { %446 = vmatprep.subr.bf16.mxu0 %v1463_v0 }
  0x28   : > { %447 = vmatpush1.bf16.msra.mxu0 %v1409_v8 }
  0x29   : > { %448 = vmatprep.subr.bf16.mxu0 %v1463_v0 }
  0x2c   : > { %449 = vmatpush1.bf16.msra.mxu0 %v1410_v9 }
  0x2d   : > { %458 = vmatprep.subr.bf16.mxu0 %v1463_v0 }
  0x30   : > { %459 = vmatpush2.bf16.msra.mxu0 %v1411_v10  ;;  %v308_v10 = vld [vmem:[%s1779_s5 + $0x18] sm:$0xff] }
  0x31   : > { %460 = vmatprep.subr.bf16.mxu0 %v1463_v0 }
  0x34   : > { %461 = vmatpush2.bf16.msra.mxu0 %v1412_v11 }
  0x35   : > { %462 = vmatprep.subr.bf16.mxu0 %v1463_v0 }
  0x38   : > { %463 = vmatpush2.bf16.msra.mxu0 %v1413_v12 }
  0x39   : > { %464 = vmatprep.subr.bf16.mxu0 %v1463_v0 }
  0x3c   : > { %465 = vmatpush2.bf16.msra.mxu0 %v1414_v13  ;;  %v306_v13 = vld [vmem:[%s1779_s5 + $0x8] sm:$0xff] }
  0x3f   : > { %467 = vmatmul.mubr.bf16.vlgmr.msra.gmra.mxu0 %v1415_v14 }
  0x40   : > { %1244 = vmatprep.mubr.msk.bf16.mxu0 %vm427_vm0, %v1418_v15 }
  0x47   : > { %475 = vmatmul.mubr.bf16.gmra.mxu0 %v1420_v16  ;;  %v311_v16 = vld [vmem:[%s1780_s6 + $0x10] sm:$0xff] }
  0x48   : > { %1342 = vmatprep.mubr.msk.f32.mxu0 %vm483_vm1, %v284_v17 }
  0xff   : > { %v468_v18 = vpop.f32.mrf.mxu0 }
 0x101   : > { %v470_v19 = vpop.f32.mrf.mxu0 }
 0x103   : > { %v471_v20 = vpop.f32.mrf.mxu0 }
 0x105   : > { %v473_v21 = vpop.f32.mrf.mxu0 }
 0x106   : > { %v307_v21 = vld [vmem:[%s1779_s5 + $0x10] sm:$0xff] }
 0x107   : > { %v476_v22 = vpop.f32.mrf.mxu0 }
 0x109   : > { %v478_v23 = vpop.f32.mrf.mxu0 }
 0x10a   : > { %v310_v23 = vld [vmem:[%s1780_s6 + $0x8] sm:$0xff] }
 0x10b   : > { %v479_v24 = vpop.f32.mrf.mxu0 }
 0x10c   : > { %1334 = vmatprep.subr.mxu0 %v479_v24 }
 0x10d   : > { %v481_v25 = vpop.f32.mrf.mxu0  ;;  %1335 = vmatpush3.msra.mxu0 %v479_v24 }
 0x10e   : > { %1336 = vmatprep.subr.mxu0 %v476_v22  ;;  %v1464_v25 = vmov 0.0  }
 0x10f   : > { %1337 = vmatpush3.msra.mxu0 %v476_v22 }
 0x110   : > { %1338 = vmatprep.subr.mxu0 %v471_v20 }
 0x111   : > { %1339 = vmatpush3.msra.mxu0 %v471_v20 }
 0x112   : > { %1340 = vmatprep.subr.mxu0 %v468_v18 }
 0x113   : > { %1341 = vmatpush3.msra.mxu0 %v468_v18 }
 0x114   : > { %1343 = vmatmul.mubr.msk.f32.vlgmr.msra.gmra.mxu0 %vm483_vm1, %v285_v26  ;;  %1362 = vmatprep.subr.mxu0 %v1464_v25 }
 0x115   : > { %1345 = vmatprep.mubr.msk.f32.mxu0 %vm483_vm1, %v286_v27 }
 0x118   : > { %1346 = vmatmul.mubr.msk.f32.gmra.mxu0 %vm483_vm1, %v287_v28 }
 0x119   : > { %1370 = vmatprep.mubr.msk.f32.mxu0 %vm1465_vm2, %v1464_v25 }
 0x1d4   : > { %v1344_v29 = vpop.f32.mrf.mxu0 }
 0x1d5   : > { %v584_v30 = vsel %vm427_vm0, %v1344_v29, 0.0 }
 0x1d6   : > { %585 = vadd.xlane.f32.xlu1 %v584_v30  ;;  %v562_v31 = vpop.f32.mrf.mxu0 }
 0x1d7   : > { %v581_v33 = vsel %vm427_vm0, %v562_v31, 0.0 }
 0x1d8   : > { %v1347_v32 = vpop.f32.mrf.mxu0 }
 0x1d9   : > { %v590_v34 = vsel %vm427_vm0, %v1347_v32, 0.0 }
 0x1da   : > { %582 = vadd.xlane.f32.xlu1 %v581_v33  ;;  %591 = vadd.xlane.f32.xlu0 %v590_v34  ;;  %v572_v35 = vpop.f32.mrf.mxu0 }
 0x1db   : > { %v587_v36 = vsel %vm427_vm0, %v572_v35, 0.0 }
 0x1de   : > { %588 = vadd.xlane.f32.xlu0 %v587_v36 }
 0x25f   : > { %v586_v37 = vpop.xlane.xlu1 %585 }
 0x260   : > { %v594_v41 = vmul.f32 0.001953125, %v586_v37 }
 0x262   : > { %v1589_v47 = vsub.f32 %v471_v20, %v594_v41 }
 0x263   : > { %v592_v38 = vpop.xlane.xlu0 %591  ;;  %v583_v40 = vpop.xlane.xlu1 %582 }
 0x264   : > { %v596_v39 = vmul.f32 0.001953125, %v592_v38  ;;  %v593_v44 = vmul.f32 0.001953125, %v583_v40  ;;  %v602_v51 = vmul.f32 %v1589_v47, %v1589_v47 }
 0x266   : > { %v1585_v42 = vsub.f32 %v479_v24, %v596_v39  ;;  %v1593_v49 = vsub.f32 %v468_v18, %v593_v44  ;;  %v305_v18 = vld [vmem:[%s1779_s5] sm:$0xff] }
 0x267   : > { %v589_v43 = vpop.xlane.xlu0 %588  ;;  %v309_v24 = vld [vmem:[%s1780_s6] sm:$0xff] }
 0x268   : > { %v595_v45 = vmul.f32 0.001953125, %v589_v43  ;;  %v604_v46 = vmul.f32 %v1585_v42, %v1585_v42  ;;  %v601_v52 = vmul.f32 %v1593_v49, %v1593_v49 }
 0x26a   : > { %v1591_v48 = vsub.f32 %v476_v22, %v595_v45  ;;  %1348 = vmatprep.subr.mxu1 %v604_v46 }
 0x26b   : > { %1349 = vmatpush3.msra.mxu1 %v604_v46 }
 0x26c   : > { %v603_v50 = vmul.f32 %v1591_v48, %v1591_v48 }
 0x26e   : > { %1350 = vmatprep.subr.mxu1 %v603_v50 }
 0x26f   : > { %1351 = vmatpush3.msra.mxu1 %v603_v50 }
 0x270   : > { %1352 = vmatprep.subr.mxu1 %v602_v51 }
 0x271   : > { %1353 = vmatpush3.msra.mxu1 %v602_v51 }
 0x272   : > { %1354 = vmatprep.subr.mxu1 %v601_v52 }
 0x273   : > { %1355 = vmatpush3.msra.mxu1 %v601_v52 }
 0x274   : > { %1357 = vmatmul.mubr.msk.f32.vlgmr.msra.gmra.mxu1 %vm483_vm1, %v285_v26 }
 0x275   : > { %1359 = vmatprep.mubr.msk.f32.mxu1 %vm483_vm1, %v286_v27 }
 0x278   : > { %1360 = vmatmul.mubr.msk.f32.gmra.mxu1 %vm483_vm1, %v287_v28 }
 0x334   : > { %v1358_v53 = vpop.f32.mrf.mxu1 }
 0x335   : > { %v693_v59 = vsel %vm427_vm0, %v1358_v53, 0.0 }
 0x336   : > { %v671_v54 = vpop.f32.mrf.mxu1 }
 0x337   : > { %v690_v60 = vsel %vm427_vm0, %v671_v54, 0.0 }
 0x338   : > { %v1361_v55 = vpop.f32.mrf.mxu1 }
 0x339   : > { %v699_v56 = vsel %vm427_vm0, %v1361_v55, 0.0 }
 0x33a   : > { %700 = vadd.xlane.f32.xlu0 %v699_v56  ;;  %v681_v57 = vpop.f32.mrf.mxu1 }
 0x33b   : > { %v696_v58 = vsel %vm427_vm0, %v681_v57, 0.0 }
 0x33c   : > { %697 = vadd.xlane.f32.xlu1 %v696_v58 }
 0x33e   : > { %694 = vadd.xlane.f32.xlu0 %v693_v59 }
 0x340   : > { %691 = vadd.xlane.f32.xlu1 %v690_v60 }
 0x351   : > { %759 = vperm.xlu1 %1402, %v312_v61  }
 0x3c3   : > { %v701_v62 = vpop.xlane.xlu0 %700 }
 0x3c4   : > { %v705_v63 = vmul.f32 0.001953125, %v701_v62 }
 0x3c5   : > { %v698_v0 = vpop.xlane.xlu1 %697 }
 0x3c6   : > { %v709_v1 = vadd.f32 1e-05, %v705_v63  ;;  %v704_v7 = vmul.f32 0.001953125, %v698_v0 }
 0x3c7   : > { %v695_v2 = vpop.xlane.xlu0 %694 }
 0x3c8   : > { %1421 = vrsqrt.f32 %v709_v1  ;;  %v703_v3 = vmul.f32 0.001953125, %v695_v2  ;;  %v708_v9 = vadd.f32 1e-05, %v704_v7 }
 0x3c9   : > { %v692_v4 = vpop.xlane.xlu1 %691 }
 0x3ca   : > { %v707_v5 = vadd.f32 1e-05, %v703_v3  ;;  %v702_v6 = vmul.f32 0.001953125, %v692_v4 }
 0x3cc   : > { %1423 = vrsqrt.f32 %v707_v5  ;;  %v706_v8 = vadd.f32 1e-05, %v702_v6 }
 0x3cd   : > { %v760_v26 = vpop.permute.xlu1 %759 }
 0x3ce   : > { %1425 = vrsqrt.f32 %v706_v8 }
 0x3cf   : > { %1427 = vrsqrt.f32 %v708_v9 }
 0x3d5   : > { %v1422_v11 = vpop.eup %1421 }
 0x3d6   : > { %v717_v12 = vmul.f32 %v1422_v11, %v308_v10 }
 0x3d8   : > { %735 = vperm.xlu0 %1401, %v717_v12  }
 0x3d9   : > { %v1424_v14 = vpop.eup %1423 }
 0x3da   : > { %v715_v15 = vmul.f32 %v1424_v14, %v306_v13  ;;  %v288_v14 = vld [vmem:[%s1777_s3] sm:$0xff] }
 0x3db   : > { %v1426_v17 = vpop.eup %1425 }
 0x3dc   : > { %725 = vperm.xlu1 %1402, %v715_v15   ;;  %v714_v19 = vmul.f32 %v1426_v17, %v305_v18  ;;  %v1428_v20 = vpop.eup %1427 }
 0x3dd   : > { %v716_v22 = vmul.f32 %v1428_v20, %v307_v21 }
 0x3e0   : > { %754 = vperm.xlu1 %1402, %v311_v16  }
 0x3e4   : > { %720 = vperm.xlu1 %1402, %v714_v19  }
 0x3e8   : > { %730 = vperm.xlu1 %1402, %v716_v22  }
 0x3ec   : > { %749 = vperm.xlu1 %1402, %v310_v23  }
 0x3f0   : > { %744 = vperm.xlu1 %1402, %v309_v24  }
 0x453   : > { %v736_v27 = vpop.permute.xlu0 %735 }
 0x454   : > { %v741_v28 = vmul.f32 %v736_v27, %v1585_v42 }
 0x456   : > { %v765_v29 = vadd.f32 %v760_v26, %v741_v28 }
 0x457   : > { %v726_v30 = vpop.permute.xlu1 %725 }
 0x458   : > { %v773_v31 = vmul.f32 0.044715, %v765_v29  ;;  %v739_v40 = vmul.f32 %v726_v30, %v1589_v47  ;;  %v769_v59 = vmul.f32 0.5, %v765_v29 }
 0x45a   : > { %v777_v32 = vmul.f32 %v773_v31, %v765_v29 }
 0x45b   : > { %v755_v33 = vpop.permute.xlu1 %754 }
 0x45c   : > { %v781_v34 = vmul.f32 %v777_v32, %v765_v29 }
 0x45e   : > { %v785_v35 = vadd.f32 %v781_v34, %v765_v29 }
 0x45f   : > { %v721_v36 = vpop.permute.xlu1 %720 }
 0x460   : > { %v789_v37 = vmul.f32 0.7978846, %v785_v35  ;;  %v738_v42 = vmul.f32 %v721_v36, %v1593_v49  ;;  %v290_v36 = vld [vmem:[%s1778_s4 + $0x8] sm:$0xff] }
 0x461   : > { %1042 = vmatprep.mubr.f32.mxu1 %v290_v36 }
 0x462   : > { %1429 = vtanh.f32 %v789_v37 }
 0x463   : > { %v731_v38 = vpop.permute.xlu1 %730 }
 0x464   : > { %v740_v39 = vmul.f32 %v731_v38, %v1591_v48 }
 0x466   : > { %v764_v41 = vadd.f32 %v755_v33, %v740_v39 }
 0x467   : > { %v750_v43 = vpop.permute.xlu1 %749 }
 0x468   : > { %v772_v44 = vmul.f32 0.044715, %v764_v41  ;;  %v763_v45 = vadd.f32 %v750_v43, %v739_v40  ;;  %v768_v3 = vmul.f32 0.5, %v764_v41 }
 0x46a   : > { %v776_v46 = vmul.f32 %v772_v44, %v764_v41  ;;  %v771_v50 = vmul.f32 0.044715, %v763_v45  ;;  %v767_v7 = vmul.f32 0.5, %v763_v45 }
 0x46b   : > { %v745_v51 = vpop.permute.xlu1 %744 }
 0x46c   : > { %v780_v52 = vmul.f32 %v776_v46, %v764_v41  ;;  %v775_v53 = vmul.f32 %v771_v50, %v763_v45  ;;  %v762_v54 = vadd.f32 %v745_v51, %v738_v42 }
 0x46e   : > { %v779_v55 = vmul.f32 %v775_v53, %v763_v45  ;;  %v770_v56 = vmul.f32 0.044715, %v762_v54  ;;  %v784_v57 = vadd.f32 %v780_v52, %v764_v41  ;;  %v766_v11 = vmul.f32 0.5, %v762_v54 }
 0x46f   : > { %v1430_v58 = vpop.eup %1429 }
 0x470   : > { %v783_v48 = vadd.f32 %v779_v55, %v763_v45  ;;  %v774_v60 = vmul.f32 %v770_v56, %v762_v54  ;;  %v797_v47 = vadd.f32 1.0, %v1430_v58  ;;  %v788_v61 = vmul.f32 0.7978846, %v784_v57 }
 0x472   : > { %v778_v62 = vmul.f32 %v774_v60, %v762_v54  ;;  %v801_v63 = vmul.f32 %v797_v47, %v769_v59  ;;  %1431 = vtanh.f32 %v788_v61  ;;  %v787_v0 = vmul.f32 0.7978846, %v783_v48  ;;  %v289_v60 = vld [vmem:[%s1778_s4] sm:$0xff]  ;;  %v292_v47 = vld [vmem:[%s1778_s4 + $0x18] sm:$0xff]  ;;  %v291_v61 = vld [vmem:[%s1778_s4 + $0x10] sm:$0xff] }
 0x474   : > { %v782_v49 = vadd.f32 %v778_v62, %v762_v54  ;;  %1363 = vmatpush3.msra.mxu0 %v801_v63  ;;  %1433 = vtanh.f32 %v787_v0  ;;  %v294_v62 = vld [vmem:[%s1778_s4 + $0x28] sm:$0xff]  ;;  %v293_v63 = vld [vmem:[%s1778_s4 + $0x20] sm:$0xff]  ;;  %v296_v0 = vld [vmem:[%s1778_s4 + $0x38] sm:$0xff] }
 0x475   : > { %1364 = vmatprep.subr.mxu0 %v1464_v25 }
 0x476   : > { %v786_v1 = vmul.f32 0.7978846, %v782_v49  ;;  %v295_v49 = vld [vmem:[%s1778_s4 + $0x30] sm:$0xff] }
 0x478   : > { %1435 = vtanh.f32 %v786_v1  ;;  %v298_v1 = vld [vmem:[%s1778_s4 + $0x48] sm:$0xff] }
 0x47f   : > { %v1432_v2 = vpop.eup %1431 }
 0x480   : > { %v796_v4 = vadd.f32 1.0, %v1432_v2  ;;  %v297_v2 = vld [vmem:[%s1778_s4 + $0x40] sm:$0xff] }
 0x481   : > { %v1434_v5 = vpop.eup %1433 }
 0x482   : > { %v800_v6 = vmul.f32 %v796_v4, %v768_v3  ;;  %v795_v8 = vadd.f32 1.0, %v1434_v5  ;;  %v300_v3 = vld [vmem:[%s1778_s4 + $0x58] sm:$0xff]  ;;  %v299_v4 = vld [vmem:[%s1778_s4 + $0x50] sm:$0xff]  ;;  %v302_v5 = vld [vmem:[%s1778_s4 + $0x68] sm:$0xff] }
 0x484   : > { %1365 = vmatpush3.msra.mxu0 %v800_v6  ;;  %v799_v9 = vmul.f32 %v795_v8, %v767_v7  ;;  %v301_v6 = vld [vmem:[%s1778_s4 + $0x60] sm:$0xff]  ;;  %v304_v7 = vld [vmem:[%s1778_s4 + $0x78] sm:$0xff]  ;;  %v303_v8 = vld [vmem:[%s1778_s4 + $0x70] sm:$0xff] }
 0x485   : > { %v1436_v10 = vpop.eup %1435  ;;  %1366 = vmatprep.subr.mxu0 %v1464_v25 }
 0x486   : > { %1367 = vmatpush3.msra.mxu0 %v799_v9  ;;  %v794_v12 = vadd.f32 1.0, %v1436_v10 }
 0x487   : > { %1368 = vmatprep.subr.mxu0 %v1464_v25 }
 0x488   : > { %v798_v13 = vmul.f32 %v794_v12, %v766_v11 }
 0x48a   : > { %1369 = vmatpush3.msra.mxu0 %v798_v13 }
 0x48b   : > { %1371 = vmatmul.mubr.msk.f32.vlgmr.msra.gmra.mxu0 %vm483_vm1, %v288_v14 }
 0x54b   : > { %v871_v15 = vpop.f32.mrf.mxu0 }
 0x54c   : > { %v876_v16 = vmul.f32 0.044715, %v871_v15  ;;  %v875_v23 = vmul.f32 0.5, %v871_v15 }
 0x54d   : > { %v1372_v17 = vpop.f32.mrf.mxu0 }
 0x54e   : > { %v877_v18 = vmul.f32 %v876_v16, %v871_v15 }
 0x550   : > { %v878_v19 = vmul.f32 %v877_v18, %v871_v15 }
 0x552   : > { %v879_v20 = vadd.f32 %v878_v19, %v871_v15 }
 0x554   : > { %v880_v21 = vmul.f32 0.7978846, %v879_v20 }
 0x556   : > { %1437 = vtanh.f32 %v880_v21 }
 0x563   : > { %v1438_v22 = vpop.eup %1437 }
 0x564   : > { %v882_v24 = vadd.f32 1.0, %v1438_v22 }
 0x566   : > { %v1645_v25 = vmul.f32 %v882_v24, %v875_v23 }
 0x568   : > { %924 = vrot.lane.b32.xlu0 %v1645_v25, %s1466_s20  ;;  %927 = vrot.lane.b32.xlu1 %v1645_v25, %s1467_s21 }
 0x56c   : > { %918 = vrot.lane.b32.xlu0 %v1645_v25, %s1468_s22  ;;  %921 = vrot.lane.b32.xlu1 %v1645_v25, %s1469_s23 }
 0x570   : > { %912 = vrot.lane.b32.xlu0 %v1645_v25, %s1470_s26  ;;  %915 = vrot.lane.b32.xlu1 %v1645_v25, %s1471_s27 }
 0x574   : > { %906 = vrot.lane.b32.xlu0 %v1645_v25, %s1472_s28  ;;  %909 = vrot.lane.b32.xlu1 %v1645_v25, %s1473_s29  ;;  %s1256_s28 = sshll.u32 %s1783_s25, 6 }
 0x578   : > { %900 = vrot.lane.b32.xlu0 %v1645_v25, %s1474_s30  ;;  %903 = vrot.lane.b32.xlu1 %v1645_v25, %s1475_s8  ;;  %s1750_s8 = scalar_lea.vmem %s1781_s7, %s1256_s28 }
 0x57c   : > { %894 = vrot.lane.b32.xlu0 %v1645_v25, %s1476_s9  ;;  %897 = vrot.lane.b32.xlu1 %v1645_v25, %s1477_s10 }
 0x580   : > { %888 = vrot.lane.b32.xlu0 %v1645_v25, %s1478_s11  ;;  %891 = vrot.lane.b32.xlu1 %v1645_v25, %s1479_s12 }
 0x584   : > { %885 = vrot.lane.b32.xlu1 %v1645_v25, %s1480_s13 }
 0x5da   : > { %v925_v26 = vpop.permute.xlu0 %924  ;;  %v928_v27 = vpop.permute.xlu1 %927 }
 0x5db   : > { %958 = vrot.lane.b32.xlu1 %v925_v26, %s1481_s14  ;;  %960 = vrot.lane.b32.xlu0 %v928_v27, %s1481_s14 }
 0x5de   : > { %v919_v28 = vpop.permute.xlu0 %918  ;;  %v922_v29 = vpop.permute.xlu1 %921 }
 0x5df   : > { %954 = vrot.lane.b32.xlu1 %v919_v28, %s1481_s14  ;;  %956 = vrot.lane.b32.xlu0 %v922_v29, %s1481_s14 }
 0x5e2   : > { %v913_v30 = vpop.permute.xlu0 %912  ;;  %v916_v31 = vpop.permute.xlu1 %915 }
 0x5e3   : > { %950 = vrot.lane.b32.xlu1 %v913_v30, %s1481_s14  ;;  %952 = vrot.lane.b32.xlu0 %v916_v31, %s1481_s14 }
 0x5e6   : > { %v907_v32 = vpop.permute.xlu0 %906  ;;  %v910_v33 = vpop.permute.xlu1 %909 }
 0x5e7   : > { %946 = vrot.lane.b32.xlu1 %v907_v32, %s1481_s14  ;;  %948 = vrot.lane.b32.xlu0 %v910_v33, %s1481_s14 }
 0x5ea   : > { %v901_v34 = vpop.permute.xlu0 %900  ;;  %v904_v35 = vpop.permute.xlu1 %903 }
 0x5eb   : > { %942 = vrot.lane.b32.xlu1 %v901_v34, %s1481_s14  ;;  %944 = vrot.lane.b32.xlu0 %v904_v35, %s1481_s14 }
 0x5ee   : > { %v895_v37 = vpop.permute.xlu0 %894  ;;  %v898_v38 = vpop.permute.xlu1 %897 }
 0x5ef   : > { %938 = vrot.lane.b32.xlu1 %v895_v37, %s1481_s14  ;;  %940 = vrot.lane.b32.xlu0 %v898_v38, %s1481_s14 }
 0x5f2   : > { %v889_v39 = vpop.permute.xlu0 %888  ;;  %v892_v40 = vpop.permute.xlu1 %891 }
 0x5f3   : > { %934 = vrot.lane.b32.xlu1 %v889_v39, %s1481_s14  ;;  %936 = vrot.lane.b32.xlu0 %v892_v40, %s1481_s14 }
 0x5f6   : > { %v886_v41 = vpop.permute.xlu1 %885 }
 0x5f7   : > { %930 = vrot.lane.b32.xlu1 %v1645_v25, %s1481_s14  ;;  %932 = vrot.lane.b32.xlu0 %v886_v41, %s1481_s14 }
 0x64d   : > { %v961_v43 = vpop.permute.xlu0 %960  ;;  %v959_v44 = vpop.permute.xlu1 %958 }
 0x64e   : > { %1278 = vmatprep.subr.mxu1 %v961_v43 }
 0x64f   : > { %1279 = vmatpush3.msra.mxu1 %v928_v27 }
 0x650   : > { %1280 = vmatprep.subr.mxu1 %v959_v44 }
 0x651   : > { %v957_v45 = vpop.permute.xlu0 %956  ;;  %1281 = vmatpush3.msra.mxu1 %v925_v26  ;;  %v955_v42 = vpop.permute.xlu1 %954 }
 0x652   : > { %1282 = vmatprep.subr.mxu1 %v957_v45 }
 0x653   : > { %1283 = vmatpush3.msra.mxu1 %v922_v29 }
 0x654   : > { %1284 = vmatprep.subr.mxu1 %v955_v42 }
 0x655   : > { %v953_v46 = vpop.permute.xlu0 %952  ;;  %1285 = vmatpush3.msra.mxu1 %v919_v28  ;;  %v951_v50 = vpop.permute.xlu1 %950 }
 0x656   : > { %1286 = vmatprep.subr.mxu1 %v953_v46 }
 0x657   : > { %1287 = vmatpush3.msra.mxu1 %v916_v31 }
 0x658   : > { %1288 = vmatprep.subr.mxu1 %v951_v50 }
 0x659   : > { %v949_v51 = vpop.permute.xlu0 %948  ;;  %1289 = vmatpush3.msra.mxu1 %v913_v30  ;;  %v947_v52 = vpop.permute.xlu1 %946 }
 0x65a   : > { %1290 = vmatprep.subr.mxu1 %v949_v51 }
 0x65b   : > { %1291 = vmatpush3.msra.mxu1 %v910_v33 }
 0x65c   : > { %1292 = vmatprep.subr.mxu1 %v947_v52 }
 0x65d   : > { %v945_v53 = vpop.permute.xlu0 %944  ;;  %1293 = vmatpush3.msra.mxu1 %v907_v32  ;;  %v943_v54 = vpop.permute.xlu1 %942 }
 0x65e   : > { %1294 = vmatprep.subr.mxu1 %v945_v53 }
 0x65f   : > { %1295 = vmatpush3.msra.mxu1 %v904_v35 }
 0x660   : > { %1296 = vmatprep.subr.mxu1 %v943_v54 }
 0x661   : > { %v941_v55 = vpop.permute.xlu0 %940  ;;  %1297 = vmatpush3.msra.mxu1 %v901_v34  ;;  %v939_v56 = vpop.permute.xlu1 %938 }
 0x662   : > { %1298 = vmatprep.subr.mxu1 %v941_v55 }
 0x663   : > { %1299 = vmatpush3.msra.mxu1 %v898_v38 }
 0x664   : > { %1300 = vmatprep.subr.mxu1 %v939_v56 }
 0x665   : > { %v937_v57 = vpop.permute.xlu0 %936  ;;  %1301 = vmatpush3.msra.mxu1 %v895_v37  ;;  %v935_v58 = vpop.permute.xlu1 %934 }
 0x666   : > { %1302 = vmatprep.subr.mxu1 %v937_v57 }
 0x667   : > { %1303 = vmatpush3.msra.mxu1 %v892_v40 }
 0x668   : > { %1304 = vmatprep.subr.mxu1 %v935_v58 }
 0x669   : > { %v933_v59 = vpop.permute.xlu0 %932  ;;  %1305 = vmatpush3.msra.mxu1 %v889_v39  ;;  %v931_v48 = vpop.permute.xlu1 %930 }
 0x66a   : > { %1306 = vmatprep.subr.mxu1 %v933_v59 }
 0x66b   : > { %1307 = vmatpush3.msra.mxu1 %v886_v41 }
 0x66c   : > { %1308 = vmatprep.subr.mxu1 %v931_v48 }
 0x66d   : > { %1309 = vmatpush3.msra.mxu1 %v1645_v25 }
 0x66e   : > { %1043 = vmatmul.mubr.f32.vlgmr.msra.gmra.mxu1 %v289_v60 }
 0x66f   : > { %1047 = vmatprep.mubr.f32.mxu1 %v292_v47 }
 0x672   : > { %1048 = vmatmul.mubr.f32.gmra.mxu1 %v291_v61 }
 0x673   : > { %1052 = vmatprep.mubr.f32.mxu1 %v294_v62 }
 0x676   : > { %1053 = vmatmul.mubr.f32.gmra.mxu1 %v293_v63 }
 0x677   : > { %1057 = vmatprep.mubr.f32.mxu1 %v296_v0 }
 0x67a   : > { %1058 = vmatmul.mubr.f32.gmra.mxu1 %v295_v49 }
 0x67b   : > { %1062 = vmatprep.mubr.f32.mxu1 %v298_v1 }
 0x67e   : > { %1063 = vmatmul.mubr.f32.gmra.mxu1 %v297_v2 }
 0x67f   : > { %1067 = vmatprep.mubr.f32.mxu1 %v300_v3 }
 0x682   : > { %1068 = vmatmul.mubr.f32.gmra.mxu1 %v299_v4 }
 0x683   : > { %1072 = vmatprep.mubr.f32.mxu1 %v302_v5 }
 0x686   : > { %1073 = vmatmul.mubr.f32.gmra.mxu1 %v301_v6 }
 0x687   : > { %1077 = vmatprep.mubr.f32.mxu1 %v304_v7 }
 0x68a   : > { %1078 = vmatmul.mubr.f32.gmra.mxu1 %v303_v8 }
 0x72e   : > { %v1310_v9 = vpop.f32.mrf.mxu1 }
 0x730   : > { %v1311_v10 = vpop.f32.mrf.mxu1 }
 0x731   : > { %v1312_v11 = vadd.f32 %v1311_v10, %v1310_v9 }
 0x732   : > { %v1313_v12 = vpop.f32.mrf.mxu1 }
 0x733   : > { %v1091_v13 = vmul.f32 0.044715, %v1312_v11  ;;  %v1083_v60 = vmul.f32 0.5, %v1312_v11 }
 0x734   : > { %v1314_v14 = vpop.f32.mrf.mxu1 }
 0x735   : > { %v1099_v15 = vmul.f32 %v1312_v11, %v1091_v13  ;;  %v1315_v16 = vadd.f32 %v1314_v14, %v1313_v12 }
 0x736   : > { %v1316_v17 = vpop.f32.mrf.mxu1 }
 0x737   : > { %v1107_v18 = vmul.f32 %v1312_v11, %v1099_v15  ;;  %v1092_v19 = vmul.f32 0.044715, %v1315_v16  ;;  %v1084_v5 = vmul.f32 0.5, %v1315_v16 }
 0x738   : > { %v1317_v20 = vpop.f32.mrf.mxu1 }
 0x739   : > { %v1115_v21 = vadd.f32 %v1312_v11, %v1107_v18  ;;  %v1100_v22 = vmul.f32 %v1315_v16, %v1092_v19  ;;  %v1728_v23 = vadd.f32 %v1317_v20, %v1316_v17 }
 0x73a   : > { %v1319_v24 = vpop.f32.mrf.mxu1 }
 0x73b   : > { %v1123_v25 = vmul.f32 0.7978846, %v1115_v21  ;;  %v1108_v26 = vmul.f32 %v1315_v16, %v1100_v22  ;;  %v1093_v27 = vmul.f32 0.044715, %v1728_v23  ;;  %v1085_v14 = vmul.f32 0.5, %v1728_v23 }
 0x73c   : > { %v1320_v28 = vpop.f32.mrf.mxu1 }
 0x73d   : > { %1439 = vtanh.f32 %v1123_v25  ;;  %v1116_v29 = vadd.f32 %v1315_v16, %v1108_v26  ;;  %v1101_v30 = vmul.f32 %v1728_v23, %v1093_v27  ;;  %v1732_v31 = vadd.f32 %v1320_v28, %v1319_v24 }
 0x73e   : > { %v1322_v32 = vpop.f32.mrf.mxu1 }
 0x73f   : > { %v1124_v33 = vmul.f32 0.7978846, %v1116_v29  ;;  %v1109_v34 = vmul.f32 %v1728_v23, %v1101_v30  ;;  %v1094_v35 = vmul.f32 0.044715, %v1732_v31  ;;  %v1086_v21 = vmul.f32 0.5, %v1732_v31 }
 0x740   : > { %v1323_v36 = vpop.f32.mrf.mxu1 }
 0x741   : > { %1441 = vtanh.f32 %v1124_v33  ;;  %v1117_v37 = vadd.f32 %v1728_v23, %v1109_v34  ;;  %v1102_v38 = vmul.f32 %v1732_v31, %v1094_v35  ;;  %v1738_v39 = vadd.f32 %v1323_v36, %v1322_v32 }
 0x742   : > { %v1325_v40 = vpop.f32.mrf.mxu1 }
 0x743   : > { %v1125_v41 = vmul.f32 0.7978846, %v1117_v37  ;;  %v1110_v43 = vmul.f32 %v1732_v31, %v1102_v38  ;;  %v1095_v44 = vmul.f32 0.044715, %v1738_v39  ;;  %v1087_v23 = vmul.f32 0.5, %v1738_v39 }
 0x744   : > { %v1326_v45 = vpop.f32.mrf.mxu1 }
 0x745   : > { %1443 = vtanh.f32 %v1125_v41  ;;  %v1118_v42 = vadd.f32 %v1732_v31, %v1110_v43  ;;  %v1103_v46 = vmul.f32 %v1738_v39, %v1095_v44  ;;  %v1327_v50 = vadd.f32 %v1326_v45, %v1325_v40 }
 0x746   : > { %v1328_v51 = vpop.f32.mrf.mxu1 }
 0x747   : > { %v1126_v52 = vmul.f32 0.7978846, %v1118_v42  ;;  %v1111_v53 = vmul.f32 %v1738_v39, %v1103_v46  ;;  %v1096_v54 = vmul.f32 0.044715, %v1327_v50  ;;  %v1088_v30 = vmul.f32 0.5, %v1327_v50 }
 0x748   : > { %v1329_v55 = vpop.f32.mrf.mxu1 }
 0x749   : > { %1445 = vtanh.f32 %v1126_v52  ;;  %v1119_v56 = vadd.f32 %v1738_v39, %v1111_v53  ;;  %v1104_v57 = vmul.f32 %v1327_v50, %v1096_v54  ;;  %v1330_v58 = vadd.f32 %v1329_v55, %v1328_v51 }
 0x74a   : > { %v1440_v59 = vpop.eup %1439  ;;  %v1331_v48 = vpop.f32.mrf.mxu1 }
 0x74b   : > { %v1139_v47 = vadd.f32 1.0, %v1440_v59  ;;  %v1127_v61 = vmul.f32 0.7978846, %v1119_v56  ;;  %v1112_v62 = vmul.f32 %v1327_v50, %v1104_v57  ;;  %v1097_v63 = vmul.f32 0.044715, %v1330_v58 }
 0x74c   : > { %v1332_v0 = vpop.f32.mrf.mxu1  ;;  %v1089_v34 = vmul.f32 0.5, %v1330_v58 }
 0x74d   : > { %v1147_v49 = vmul.f32 %v1139_v47, %v1083_v60  ;;  %1447 = vtanh.f32 %v1127_v61  ;;  %v1120_v1 = vadd.f32 %v1327_v50, %v1112_v62  ;;  %v1333_v2 = vadd.f32 %v1332_v0, %v1331_v48 }
 0x74e   : > { %v1442_v3 = vpop.eup %1441  ;;  %v1105_v4 = vmul.f32 %v1330_v58, %v1097_v63 }
 0x74f   : > { %1156 = vst.msk [vmem:[%s1750_s8] sm:$0xff] %vm1155_vm3, %v1147_v49  ;;  %v1140_v6 = vadd.f32 1.0, %v1442_v3  ;;  %v1128_v7 = vmul.f32 0.7978846, %v1120_v1  ;;  %v1098_v8 = vmul.f32 0.044715, %v1333_v2 }
 0x750   : > { %v1113_v9 = vmul.f32 %v1330_v58, %v1105_v4  ;;  %v1090_v38 = vmul.f32 0.5, %v1333_v2 }
 0x751   : > { %v1148_v10 = vmul.f32 %v1140_v6, %v1084_v5  ;;  %1449 = vtanh.f32 %v1128_v7  ;;  %v1106_v11 = vmul.f32 %v1333_v2, %v1098_v8 }
 0x752   : > { %v1444_v12 = vpop.eup %1443  ;;  %v1121_v13 = vadd.f32 %v1330_v58, %v1113_v9 }
 0x753   : > { %1157 = vst.msk [vmem:[%s1750_s8 + $0x8] sm:$0xff] %vm1155_vm3, %v1148_v10  ;;  %v1141_v15 = vadd.f32 1.0, %v1444_v12  ;;  %v1114_v17 = vmul.f32 %v1333_v2, %v1106_v11 }
 0x754   : > { %v1129_v18 = vmul.f32 0.7978846, %v1121_v13 }
 0x755   : > { %v1149_v19 = vmul.f32 %v1141_v15, %v1085_v14  ;;  %v1122_v16 = vadd.f32 %v1333_v2, %v1114_v17 }
 0x756   : > { %v1446_v20 = vpop.eup %1445  ;;  %1451 = vtanh.f32 %v1129_v18 }
 0x757   : > { %1158 = vst.msk [vmem:[%s1750_s8 + $0x10] sm:$0xff] %vm1155_vm3, %v1149_v19  ;;  %v1142_v22 = vadd.f32 1.0, %v1446_v20  ;;  %v1130_v24 = vmul.f32 0.7978846, %v1122_v16 }
 0x759   : > { %v1150_v25 = vmul.f32 %v1142_v22, %v1086_v21  ;;  %1453 = vtanh.f32 %v1130_v24 }
 0x75a   : > { %v1448_v26 = vpop.eup %1447 }
 0x75b   : > { %1159 = vst.msk [vmem:[%s1750_s8 + $0x18] sm:$0xff] %vm1155_vm3, %v1150_v25  ;;  %v1143_v27 = vadd.f32 1.0, %v1448_v26 }
 0x75d   : > { %v1151_v28 = vmul.f32 %v1143_v27, %v1087_v23 }
 0x75e   : > { %v1450_v29 = vpop.eup %1449 }
 0x75f   : > { %1160 = vst.msk [vmem:[%s1750_s8 + $0x20] sm:$0xff] %vm1155_vm3, %v1151_v28  ;;  %v1144_v32 = vadd.f32 1.0, %v1450_v29 }
 0x761   : > { %v1152_v31 = vmul.f32 %v1144_v32, %v1088_v30 }
 0x763   : > { %v1452_v33 = vpop.eup %1451  ;;  %1161 = vst.msk [vmem:[%s1750_s8 + $0x28] sm:$0xff] %vm1155_vm3, %v1152_v31 }
 0x764   : > { %v1145_v35 = vadd.f32 1.0, %v1452_v33 }
 0x766   : > { %v1454_v36 = vpop.eup %1453  ;;  %v1153_v37 = vmul.f32 %v1145_v35, %v1089_v34 }
 0x767   : > { %v1146_v40 = vadd.f32 1.0, %v1454_v36 }
 0x768   : > { %1162 = vst.msk [vmem:[%s1750_s8 + $0x30] sm:$0xff] %vm1155_vm3, %v1153_v37 }
 0x769   : > { %v1154_v39 = vmul.f32 %v1146_v40, %v1090_v38 }
 0x76b   : > { %1163 = vst.msk [vmem:[%s1750_s8 + $0x38] sm:$0xff] %vm1155_vm3, %v1154_v39 }
 0x76c PF: > { %s17_s24 = sadd.s32 1, %s1461_s24  }
 0x76d   : > { %p14_p4 = scmp.ge.s32.totalorder %s17_s24, 4  }
 0x76f   :  { %16 = sbr.rel (!%p14_p4) target bundleno = 1 (0x1), region = 78 }

</bundles_post_ra>
